<compile_context>
chip_gen: v6e
topology: v6e:2x2x1
jax: 0.10.0
libtpu: 0.0.40
codegen_flags: <defaults>
</compile_context>

<pallas_src>
import functools

import numpy as np

import jax
import jax.numpy as jnp
from jax import lax
from jax.experimental import pallas as pl
from jax.experimental.pallas import tpu as pltpu


def _outlayer_kernel(x_ref, mask_ref, w1_ref, b1_ref, w3_ref, b3_ref,
                     w5_ref, b5_ref, out_ref, *, W, HW, Bt):
    """sigmoid(conv1x1(relu(conv3x3(relu(conv1x1(x)))))) for Bt images."""
    # Tiny constant operands: load once per grid step.
    w1 = w1_ref[...]                       # (Cmid_pad, Cin)          bf16
    w3 = w3_ref[...]                       # (Cmid_pad, 9*Cmid_pad)   bf16
    w5 = w5_ref[...]                       # (Cout, Cmid_pad)         bf16
    b1 = b1_ref[...]                       # (Cmid_pad, 1)            f32
    b3 = b3_ref[...]
    b5 = b5_ref[...]
    # Precomputed boundary masks (one lane-row per 3x3 tap), read once per step.
    mask_rows = [mask_ref[pl.ds(t, 1), :] for t in range(9)]   # each (1, HW) f32

    # Bt is a small static count -> fully unrolled straight-line code.
    for bi in range(Bt):
        x = x_ref[bi]                                           # (Cin, HW) bf16

        # ---- 1x1 conv (+folded BN) + ReLU: one bf16 MXU matmul, f32 acc -----
        y1 = jnp.dot(w1, x, preferred_element_type=jnp.float32)
        y1 = jnp.maximum(y1 + b1, 0.0)                          # (Cmid_pad, HW) f32

        # ---- 3x3 conv (padding=1) as ONE im2col matmul ----------------------
        # Tap (kh, kw): rotate y1 along lanes by d = (kh-1)*W + (kw-1) and zero
        # the out-of-image / wrapped lanes with the precomputed mask.  Patch
        # blocks are Cmid_pad rows, so the concat is 8-sublane aligned (pure
        # vreg placement, no realignment copies).
        patches = []
        for kh in range(3):
            for kw in range(3):
                d = (kh - 1) * W + (kw - 1)
                if d == 0:
                    patches.append(y1)
                else:
                    t = kh * 3 + kw
                    rolled = pltpu.roll(y1, shift=(-d) % HW, axis=1)
                    patches.append(rolled * mask_rows[t])
        p9 = jnp.concatenate(patches, axis=0)                   # (9*Cmid_pad, HW) f32

        y2 = jnp.dot(w3, p9.astype(jnp.bfloat16),
                     preferred_element_type=jnp.float32)
        y2 = jnp.maximum(y2 + b3, 0.0)                          # (Cmid_pad, HW) f32

        # ---- final 1x1 conv + sigmoid (exp and reciprocal both on the EUP) --
        y3 = jnp.dot(w5, y2.astype(jnp.bfloat16),
                     preferred_element_type=jnp.float32) + b5   # (Cout, HW) f32
        sig = pl.reciprocal(1.0 + jnp.exp(-y3), approx=True)
        out_ref[bi] = sig.astype(out_ref.dtype)


def outlayer_forward(x, params):
    """x: (N, Cin, H, W) float32 -> (N, Cout, H, W) float32 (BN folded, eval)."""
    N, Cin, H, W = x.shape
    HW = H * W
    w1f, w3f, w5 = params["w1f"], params["w3f"], params["w5"]
    Cmid, Cout = w1f.shape[0], w5.shape[0]
    Cmid_pad = ((Cmid + 7) // 8) * 8        # 8-sublane-aligned patch blocks
    pm = Cmid_pad - Cmid

    # --- fold the channel padding + im2col ordering into the (tiny) weights --
    w1p = jnp.pad(w1f, ((0, pm), (0, 0))).astype(jnp.bfloat16)       # (Cmp, Cin)
    b1p = jnp.pad(params["b1f"], (0, pm)).reshape(Cmid_pad, 1)       # f32
    # Columns ordered (kh, kw, ci-with-padding) to match the kernel's p9 stack.
    w3r = jnp.transpose(w3f, (0, 2, 3, 1))                           # (Cmid,3,3,Cmid)
    w3k = jnp.pad(w3r, ((0, pm), (0, 0), (0, 0), (0, pm))
                  ).reshape(Cmid_pad, 9 * Cmid_pad).astype(jnp.bfloat16)
    b3p = jnp.pad(params["b3f"], (0, pm)).reshape(Cmid_pad, 1)
    w5p = jnp.pad(w5, ((0, 0), (0, pm))).astype(jnp.bfloat16)        # (Cout, Cmp)
    b5p = params["b5"].reshape(Cout, 1)

    # --- precomputed 3x3 boundary masks (depend only on H, W, tap) -----------
    hh = np.arange(HW) // W
    ww = np.arange(HW) % W
    mask9 = np.stack(
        [((hh + dh >= 0) & (hh + dh < H) & (ww + dw >= 0) & (ww + dw < W))
         for dh in (-1, 0, 1) for dw in (-1, 0, 1)]).astype(np.float32)
    mask9 = jnp.asarray(mask9)                                       # (9, HW)

    # --- bf16 at the HBM boundary: halves the dominant input DMA bytes -------
    x_flat = x.reshape(N, Cin, HW).astype(jnp.bfloat16)

    # --- per-generation VMEM budget & images-per-step selection --------------
    try:
        vmem_cap = int(pltpu.get_tpu_info().vmem_capacity_bytes)
    except Exception:                       # conservative default = v7x per-TC
        vmem_cap = 64 * 2**20
    io_block = HW * (Cin * 2 + Cout * 4)    # one image: bf16 in + f32 out
    Bt = 1
    for d in range(1, N + 1):
        if N % d:                           # Bt must divide N
            continue
        if N >= 2 and N // d < 2:           # keep >=2 grid steps (v7x megacore)
            continue
        if 2 * d * io_block > vmem_cap // 4:  # double-buffered in/out blocks
            continue
        Bt = d
    steps = N // Bt

    weight_bytes = int(sum(a.size * a.dtype.itemsize
                           for a in (w1p, b1p, w3k, b3p, w5p, b5p, mask9)))
    inter_bytes = HW * 4 * (Cmid_pad * 20 + 4 * Cout)   # y1/patches/p9/y2 slack
    need = 2 * Bt * io_block + 2 * weight_bytes + inter_bytes + (1 << 20)
    vmem_limit = int(min(int(0.85 * vmem_cap), max(32 * 2**20, 2 * need)))

    def const_spec(shape):
        zeros = (0,) * len(shape)
        return pl.BlockSpec(shape, lambda b, _z=zeros: _z)

    grid_spec = pltpu.PrefetchScalarGridSpec(
        num_scalar_prefetch=0,
        grid=(steps,),
        in_specs=[
            pl.BlockSpec((Bt, Cin, HW), lambda b: (b, 0, 0)),
            const_spec((9, HW)),
            const_spec((Cmid_pad, Cin)), const_spec((Cmid_pad, 1)),
            const_spec((Cmid_pad, 9 * Cmid_pad)), const_spec((Cmid_pad, 1)),
            const_spec((Cout, Cmid_pad)), const_spec((Cout, 1)),
        ],
        out_specs=pl.BlockSpec((Bt, Cout, HW), lambda b: (b, 0, 0)),
    )

    out_flat = pl.pallas_call(
        functools.partial(_outlayer_kernel, W=W, HW=HW, Bt=Bt),
        out_shape=jax.ShapeDtypeStruct((N, Cout, HW), jnp.float32),
        grid_spec=grid_spec,
        compiler_params=pltpu.CompilerParams(
            dimension_semantics=("parallel",),   # independent steps -> both v7x TCs
            vmem_limit_bytes=vmem_limit),
    )(x_flat, mask9, w1p, b1p, w3k, b3p, w5p, b5p)
    return out_flat.reshape(N, Cout, H, W)


def ref_forward(x, p):
    """Plain-JAX f32 (NCHW) reference of the same forward pass (BN folded)."""
    hi = lax.Precision.HIGHEST
    y1 = jnp.einsum("oi,nihw->nohw", p["w1f"], x, precision=hi) \
        + p["b1f"][None, :, None, None]
    y1 = jnp.maximum(y1, 0.0)
    y2 = lax.conv_general_dilated(
        y1, p["w3f"], window_strides=(1, 1), padding=[(1, 1), (1, 1)],
        dimension_numbers=("NCHW", "OIHW", "NCHW"), precision=hi) \
        + p["b3f"][None, :, None, None]
    y2 = jnp.maximum(y2, 0.0)
    y3 = jnp.einsum("oi,nihw->nohw", p["w5"], y2, precision=hi) \
        + p["b5"][None, :, None, None]
    return jax.nn.sigmoid(y3)


if __name__ == "__main__":
    Cin, Cout = 20, 2          # input_channels=20 -> hidden width 20 // 5 = 4
    Cmid = Cin // 5
    N, H, W = 2, 16, 16
    eps = 1e-5

    key = jax.random.PRNGKey(0)
    ks = jax.random.split(key, 16)
    normal = lambda k, s, sc: sc * jax.random.normal(k, s, jnp.float32)

    # conv1x1 (Cin -> Cmid) + BatchNorm
    w1 = normal(ks[0], (Cmid, Cin), 0.3)
    b1 = normal(ks[1], (Cmid,), 0.1)
    g1 = 1.0 + normal(ks[2], (Cmid,), 0.1)
    be1 = normal(ks[3], (Cmid,), 0.1)
    m1 = normal(ks[4], (Cmid,), 0.1)
    v1 = 1.0 + jnp.abs(normal(ks[5], (Cmid,), 0.1))
    # conv3x3 (Cmid -> Cmid, padding=1) + BatchNorm
    w3 = normal(ks[6], (Cmid, Cmid, 3, 3), 0.2)
    b3 = normal(ks[7], (Cmid,), 0.1)
    g2 = 1.0 + normal(ks[8], (Cmid,), 0.1)
    be2 = normal(ks[9], (Cmid,), 0.1)
    m2 = normal(ks[10], (Cmid,), 0.1)
    v2 = 1.0 + jnp.abs(normal(ks[11], (Cmid,), 0.1))
    # conv1x1 (Cmid -> Cout)
    w5 = normal(ks[12], (Cout, Cmid), 0.3)
    b5 = normal(ks[13], (Cout,), 0.1)

    x = jax.random.normal(ks[14], (N, Cin, H, W), jnp.float32)

    # Fold BatchNorm (eval mode, running stats) into the preceding convolutions.
    s1 = g1 / jnp.sqrt(v1 + eps)
    s2 = g2 / jnp.sqrt(v2 + eps)
    params = {
        "w1f": w1 * s1[:, None],
        "b1f": (b1 - m1) * s1 + be1,
        "w3f": w3 * s2[:, None, None, None],
        "b3f": (b3 - m2) * s2 + be2,
        "w5": w5,
        "b5": b5,
    }

    out = jax.block_until_ready(outlayer_forward(x, params))
    ref = jax.block_until_ready(ref_forward(x, params))

    assert out.shape == (N, Cout, H, W), out.shape
    err = float(jnp.max(jnp.abs(out - ref)))
    mean_err = float(jnp.mean(jnp.abs(out - ref)))
    # bf16 activations/weights at the HBM/MXU boundary (per the perf review)
    # bound the max error vs. the pure-f32 reference at the ~1e-2 level.
    assert err < 2e-2, f"max abs error vs reference: {err}"
    assert mean_err < 5e-3, f"mean abs error vs reference: {mean_err}"
    print("KERNEL_OK")
</pallas_src>

<mosaic_0001>
module attributes {stable_mosaic.version = 11 : i64} {
  func.func @_outlayer_kernel(%arg0: i32, %arg1: memref<1x20x256xbf16, #tpu.memory_space<vmem>>, %arg2: memref<9x256xf32, #tpu.memory_space<vmem>>, %arg3: memref<8x20xbf16, #tpu.memory_space<vmem>>, %arg4: memref<8x1xf32, #tpu.memory_space<vmem>>, %arg5: memref<8x72xbf16, #tpu.memory_space<vmem>>, %arg6: memref<8x1xf32, #tpu.memory_space<vmem>>, %arg7: memref<2x8xbf16, #tpu.memory_space<vmem>>, %arg8: memref<2x1xf32, #tpu.memory_space<vmem>>, %arg9: memref<1x2x256xf32, #tpu.memory_space<vmem>>) attributes {dimension_semantics = [#tpu.dimension_semantics<parallel>], iteration_bounds = array<i64: 2>, scalar_prefetch = 0 : i64, scratch_operands = 0 : i64, tpu.core_type = #tpu.core_type<tc>, window_params = [{transform_indices = @transform_0, window_bounds = array<i64: 1, 20, 256>}, {pipeline_mode = #tpu.pipeline_mode<synchronous>, transform_indices = @transform_1, window_bounds = array<i64: 9, 256>}, {pipeline_mode = #tpu.pipeline_mode<synchronous>, transform_indices = @transform_2, window_bounds = array<i64: 8, 20>}, {pipeline_mode = #tpu.pipeline_mode<synchronous>, transform_indices = @transform_3, window_bounds = array<i64: 8, 1>}, {pipeline_mode = #tpu.pipeline_mode<synchronous>, transform_indices = @transform_4, window_bounds = array<i64: 8, 72>}, {pipeline_mode = #tpu.pipeline_mode<synchronous>, transform_indices = @transform_5, window_bounds = array<i64: 8, 1>}, {pipeline_mode = #tpu.pipeline_mode<synchronous>, transform_indices = @transform_6, window_bounds = array<i64: 2, 8>}, {pipeline_mode = #tpu.pipeline_mode<synchronous>, transform_indices = @transform_7, window_bounds = array<i64: 2, 1>}, {transform_indices = @transform_8, window_bounds = array<i64: 1, 2, 256>}]} {
    %c0 = arith.constant 0 : index
    %c0_0 = arith.constant 0 : index
    %0 = vector.load %arg3[%c0, %c0_0] : memref<8x20xbf16, #tpu.memory_space<vmem>>, vector<8x20xbf16>
    %c0_1 = arith.constant 0 : index
    %c0_2 = arith.constant 0 : index
    %1 = vector.load %arg5[%c0_1, %c0_2] : memref<8x72xbf16, #tpu.memory_space<vmem>>, vector<8x72xbf16>
    %c0_3 = arith.constant 0 : index
    %c0_4 = arith.constant 0 : index
    %2 = vector.load %arg7[%c0_3, %c0_4] : memref<2x8xbf16, #tpu.memory_space<vmem>>, vector<2x8xbf16>
    %c0_5 = arith.constant 0 : index
    %c0_6 = arith.constant 0 : index
    %3 = vector.load %arg4[%c0_5, %c0_6] : memref<8x1xf32, #tpu.memory_space<vmem>>, vector<8x1xf32>
    %c0_7 = arith.constant 0 : index
    %c0_8 = arith.constant 0 : index
    %4 = vector.load %arg6[%c0_7, %c0_8] : memref<8x1xf32, #tpu.memory_space<vmem>>, vector<8x1xf32>
    %c0_9 = arith.constant 0 : index
    %c0_10 = arith.constant 0 : index
    %5 = vector.load %arg8[%c0_9, %c0_10] : memref<2x1xf32, #tpu.memory_space<vmem>>, vector<2x1xf32>
    %c0_11 = arith.constant 0 : index
    %c0_12 = arith.constant 0 : index
    %6 = vector.load %arg2[%c0_11, %c0_12] : memref<9x256xf32, #tpu.memory_space<vmem>>, vector<1x256xf32>
    %c1 = arith.constant 1 : index
    %c0_13 = arith.constant 0 : index
    %7 = vector.load %arg2[%c1, %c0_13] : memref<9x256xf32, #tpu.memory_space<vmem>>, vector<1x256xf32>
    %c2 = arith.constant 2 : index
    %c0_14 = arith.constant 0 : index
    %8 = vector.load %arg2[%c2, %c0_14] : memref<9x256xf32, #tpu.memory_space<vmem>>, vector<1x256xf32>
    %c3 = arith.constant 3 : index
    %c0_15 = arith.constant 0 : index
    %9 = vector.load %arg2[%c3, %c0_15] : memref<9x256xf32, #tpu.memory_space<vmem>>, vector<1x256xf32>
    %c5 = arith.constant 5 : index
    %c0_16 = arith.constant 0 : index
    %10 = vector.load %arg2[%c5, %c0_16] : memref<9x256xf32, #tpu.memory_space<vmem>>, vector<1x256xf32>
    %c6 = arith.constant 6 : index
    %c0_17 = arith.constant 0 : index
    %11 = vector.load %arg2[%c6, %c0_17] : memref<9x256xf32, #tpu.memory_space<vmem>>, vector<1x256xf32>
    %c7 = arith.constant 7 : index
    %c0_18 = arith.constant 0 : index
    %12 = vector.load %arg2[%c7, %c0_18] : memref<9x256xf32, #tpu.memory_space<vmem>>, vector<1x256xf32>
    %c8 = arith.constant 8 : index
    %c0_19 = arith.constant 0 : index
    %13 = vector.load %arg2[%c8, %c0_19] : memref<9x256xf32, #tpu.memory_space<vmem>>, vector<1x256xf32>
    %c0_20 = arith.constant 0 : index
    %c0_21 = arith.constant 0 : index
    %c0_22 = arith.constant 0 : index
    %14 = vector.load %arg1[%c0_20, %c0_21, %c0_22] : memref<1x20x256xbf16, #tpu.memory_space<vmem>>, vector<1x20x256xbf16>
    %15 = vector.shape_cast %14 : vector<1x20x256xbf16> to vector<20x256xbf16>
    %cst = arith.constant dense<0.000000e+00> : vector<8x256xf32>
    %16 = tpu.matmul %0, %15, %cst {dimension_numbers = #tpu.dot_dimension_numbers<[1], [0], [0], [1], [0, 0, 1, 1], [], []>} : vector<8x20xbf16>, vector<20x256xbf16>, vector<8x256xf32> -> vector<8x256xf32>
    %17 = vector.broadcast %3 : vector<8x1xf32> to vector<8x256xf32>
    %18 = arith.addf %16, %17 : vector<8x256xf32>
    %cst_23 = arith.constant 0.000000e+00 : f32
    %19 = vector.broadcast %cst_23 : f32 to vector<8x256xf32>
    %20 = arith.maximumf %18, %19 : vector<8x256xf32>
    %c17_i32 = arith.constant 17 : i32
    %21 = tpu.dynamic_rotate %20 by %c17_i32 dim 1 : vector<8x256xf32>, i32 -> vector<8x256xf32>
    %22 = vector.broadcast %6 : vector<1x256xf32> to vector<8x256xf32>
    %23 = arith.mulf %21, %22 : vector<8x256xf32>
    %c16_i32 = arith.constant 16 : i32
    %24 = tpu.dynamic_rotate %20 by %c16_i32 dim 1 : vector<8x256xf32>, i32 -> vector<8x256xf32>
    %25 = vector.broadcast %7 : vector<1x256xf32> to vector<8x256xf32>
    %26 = arith.mulf %24, %25 : vector<8x256xf32>
    %c15_i32 = arith.constant 15 : i32
    %27 = tpu.dynamic_rotate %20 by %c15_i32 dim 1 : vector<8x256xf32>, i32 -> vector<8x256xf32>
    %28 = vector.broadcast %8 : vector<1x256xf32> to vector<8x256xf32>
    %29 = arith.mulf %27, %28 : vector<8x256xf32>
    %c1_i32 = arith.constant 1 : i32
    %30 = tpu.dynamic_rotate %20 by %c1_i32 dim 1 : vector<8x256xf32>, i32 -> vector<8x256xf32>
    %31 = vector.broadcast %9 : vector<1x256xf32> to vector<8x256xf32>
    %32 = arith.mulf %30, %31 : vector<8x256xf32>
    %c255_i32 = arith.constant 255 : i32
    %33 = tpu.dynamic_rotate %20 by %c255_i32 dim 1 : vector<8x256xf32>, i32 -> vector<8x256xf32>
    %34 = vector.broadcast %10 : vector<1x256xf32> to vector<8x256xf32>
    %35 = arith.mulf %33, %34 : vector<8x256xf32>
    %c241_i32 = arith.constant 241 : i32
    %36 = tpu.dynamic_rotate %20 by %c241_i32 dim 1 : vector<8x256xf32>, i32 -> vector<8x256xf32>
    %37 = vector.broadcast %11 : vector<1x256xf32> to vector<8x256xf32>
    %38 = arith.mulf %36, %37 : vector<8x256xf32>
    %c240_i32 = arith.constant 240 : i32
    %39 = tpu.dynamic_rotate %20 by %c240_i32 dim 1 : vector<8x256xf32>, i32 -> vector<8x256xf32>
    %40 = vector.broadcast %12 : vector<1x256xf32> to vector<8x256xf32>
    %41 = arith.mulf %39, %40 : vector<8x256xf32>
    %c239_i32 = arith.constant 239 : i32
    %42 = tpu.dynamic_rotate %20 by %c239_i32 dim 1 : vector<8x256xf32>, i32 -> vector<8x256xf32>
    %43 = vector.broadcast %13 : vector<1x256xf32> to vector<8x256xf32>
    %44 = arith.mulf %42, %43 : vector<8x256xf32>
    %45 = tpu.concatenate %23, %26, %29, %32, %20, %35, %38, %41, %44 in 0 : vector<8x256xf32>, vector<8x256xf32>, vector<8x256xf32>, vector<8x256xf32>, vector<8x256xf32>, vector<8x256xf32>, vector<8x256xf32>, vector<8x256xf32>, vector<8x256xf32> -> vector<72x256xf32>
    %46 = arith.truncf %45 : vector<72x256xf32> to vector<72x256xbf16>
    %cst_24 = arith.constant dense<0.000000e+00> : vector<8x256xf32>
    %47 = tpu.matmul %1, %46, %cst_24 {dimension_numbers = #tpu.dot_dimension_numbers<[1], [0], [0], [1], [0, 0, 1, 1], [], []>} : vector<8x72xbf16>, vector<72x256xbf16>, vector<8x256xf32> -> vector<8x256xf32>
    %48 = vector.broadcast %4 : vector<8x1xf32> to vector<8x256xf32>
    %49 = arith.addf %47, %48 : vector<8x256xf32>
    %cst_25 = arith.constant 0.000000e+00 : f32
    %50 = vector.broadcast %cst_25 : f32 to vector<8x256xf32>
    %51 = arith.maximumf %49, %50 : vector<8x256xf32>
    %52 = arith.truncf %51 : vector<8x256xf32> to vector<8x256xbf16>
    %cst_26 = arith.constant dense<0.000000e+00> : vector<2x256xf32>
    %53 = tpu.matmul %2, %52, %cst_26 {dimension_numbers = #tpu.dot_dimension_numbers<[1], [0], [0], [1], [0, 0, 1, 1], [], []>} : vector<2x8xbf16>, vector<8x256xbf16>, vector<2x256xf32> -> vector<2x256xf32>
    %54 = vector.broadcast %5 : vector<2x1xf32> to vector<2x256xf32>
    %55 = arith.addf %53, %54 : vector<2x256xf32>
    %cst_27 = arith.constant 0.000000e+00 : f32
    %56 = vector.broadcast %cst_27 : f32 to vector<2x256xf32>
    %57 = arith.subf %56, %55 : vector<2x256xf32>
    %58 = math.exp %57 : vector<2x256xf32>
    %cst_28 = arith.constant 1.000000e+00 : f32
    %59 = vector.broadcast %cst_28 : f32 to vector<2x256xf32>
    %60 = arith.addf %59, %58 : vector<2x256xf32>
    %61 = tpu.reciprocal %60 {approx = true} : vector<2x256xf32> -> vector<2x256xf32>
    %c0_29 = arith.constant 0 : index
    %c0_30 = arith.constant 0 : index
    %c0_31 = arith.constant 0 : index
    %62 = vector.load %arg9[%c0_29, %c0_30, %c0_31] : memref<1x2x256xf32, #tpu.memory_space<vmem>>, vector<1x2x256xf32>
    %63 = vector.shape_cast %62 : vector<1x2x256xf32> to vector<2x256xf32>
    %64 = vector.shape_cast %61 : vector<2x256xf32> to vector<1x2x256xf32>
    tpu.vector_store %arg9[%c0_29, %c0_30, %c0_31], %64 {strides = array<i32>} : memref<1x2x256xf32, #tpu.memory_space<vmem>>, vector<1x2x256xf32>,
    return
  }
  func.func @transform_0(%arg0: i32) -> (i32, i32, i32) {
    %c0_i32 = arith.constant 0 : i32
    %c0_i32_0 = arith.constant 0 : i32
    %c0_i32_1 = arith.constant 0 : i32
    return %arg0, %c0_i32, %c0_i32_0 : i32, i32, i32
  }
  func.func @transform_1(%arg0: i32) -> (i32, i32) {
    %c0_i32 = arith.constant 0 : i32
    %c0_i32_0 = arith.constant 0 : i32
    %c0_i32_1 = arith.constant 0 : i32
    return %c0_i32, %c0_i32_0 : i32, i32
  }
  func.func @transform_2(%arg0: i32) -> (i32, i32) {
    %c0_i32 = arith.constant 0 : i32
    %c0_i32_0 = arith.constant 0 : i32
    %c0_i32_1 = arith.constant 0 : i32
    return %c0_i32, %c0_i32_0 : i32, i32
  }
  func.func @transform_3(%arg0: i32) -> (i32, i32) {
    %c0_i32 = arith.constant 0 : i32
    %c0_i32_0 = arith.constant 0 : i32
    %c0_i32_1 = arith.constant 0 : i32
    return %c0_i32, %c0_i32_0 : i32, i32
  }
  func.func @transform_4(%arg0: i32) -> (i32, i32) {
    %c0_i32 = arith.constant 0 : i32
    %c0_i32_0 = arith.constant 0 : i32
    %c0_i32_1 = arith.constant 0 : i32
    return %c0_i32, %c0_i32_0 : i32, i32
  }
  func.func @transform_5(%arg0: i32) -> (i32, i32) {
    %c0_i32 = arith.constant 0 : i32
    %c0_i32_0 = arith.constant 0 : i32
    %c0_i32_1 = arith.constant 0 : i32
    return %c0_i32, %c0_i32_0 : i32, i32
  }
  func.func @transform_6(%arg0: i32) -> (i32, i32) {
    %c0_i32 = arith.constant 0 : i32
    %c0_i32_0 = arith.constant 0 : i32
    %c0_i32_1 = arith.constant 0 : i32
    return %c0_i32, %c0_i32_0 : i32, i32
  }
  func.func @transform_7(%arg0: i32) -> (i32, i32) {
    %c0_i32 = arith.constant 0 : i32
    %c0_i32_0 = arith.constant 0 : i32
    %c0_i32_1 = arith.constant 0 : i32
    return %c0_i32, %c0_i32_0 : i32, i32
  }
  func.func @transform_8(%arg0: i32) -> (i32, i32, i32) {
    %c0_i32 = arith.constant 0 : i32
    %c0_i32_0 = arith.constant 0 : i32
    %c0_i32_1 = arith.constant 0 : i32
    return %arg0, %c0_i32, %c0_i32_0 : i32, i32, i32
  }
}

</mosaic_0001>

<bundles_post_ra>
// kernel: tpu_custom_call.1
= control target key start
LH: loop header
LB: loop body
LE: loop exit
PB: predicated region body
PF: predicated region fallthrough
CT: control target
= control target key end

     0   :  { %13 = vsyncpa [#allocation3], 0  ;;  %s1204_s0 = inlined_call_operand.vmem [shape: bf16[2,20,256], index: 0, kind: input, shape index: {}]   ;;  %s1205_s1 = inlined_call_operand.vmem [shape: f32[9,256], index: 1, kind: input, shape index: {}]   ;;  %s1206_s2 = inlined_call_operand.vmem [shape: bf16[8,20], index: 2, kind: input, shape index: {}]   ;;  %s1207_s3 = inlined_call_operand.vmem [shape: f32[8,1], index: 3, kind: input, shape index: {}]   ;;  %s1208_s4 = inlined_call_operand.vmem [shape: bf16[8,72], index: 4, kind: input, shape index: {}]   ;;  %s1209_s5 = inlined_call_operand.vmem [shape: f32[8,1], index: 5, kind: input, shape index: {}]   ;;  %s1210_s6 = inlined_call_operand.vmem [shape: bf16[2,8], index: 6, kind: input, shape index: {}]   ;;  %s1211_s7 = inlined_call_operand.vmem [shape: f32[2,1], index: 7, kind: input, shape index: {}]   ;;  %s1212_s8 = inlined_call_operand.hbm [shape: f32[2,2,256], index: 8, kind: output, shape index: {}]  }
   0x1   :  { %15 = vsyncpa [#allocation3 + $0x1], 0  ;;  %s999_s27 = smov 0   ;;  %s1001_s28 = smov 0  }
   0x2   :  { %s1003_s29 = smov 0   ;;  %s1005_s30 = smov 0  }
   0x3 LB: > { %s1020_s9 = sadd.s32 4294967295, %s942_s30   ;;  %s788_s10 = sadd.s32 4294967294, %s942_s30   ;;  %s942_s30 = sphi %s1005_s30, %s1218_s30   ;;  %s938_s29 = sphi %s1003_s29, %s1217_s29   ;;  %s934_s28 = sphi %s1001_s28, %s1216_s28   ;;  %s930_s27 = sphi %s999_s27, %s1215_s27  }
   0x4   : > { %s1024_s11 = sadd.s32 1, %s942_s30   ;;  %s201_s12 = sadd.s32 1, %s938_s29 }
   0x5   : > { %s198_s13 = ssub.s32 %s942_s30, %s1024_s11  ;;  %p211_p0 = scmp.ne.s32.totalorder %s938_s29, %s934_s28 }
   0x6   : > { %p199_p1 = scmp.eq.s32.totalorder %s198_s13, 0  ;;  %p212_p2 = scmp.eq.s32.totalorder %s1020_s9, 1 }
   0x7   : > { %p217_p3 = scmp.ne.s32.totalorder %s934_s28, %s930_s27  ;;  %p218_p4 = scmp.eq.s32.totalorder %s788_s10, 1 }
   0x8   : > { %s1035_s14 = scalar_select %p199_p1, %s938_s29, %s201_s12  }
   0x9   : > { %p1037_p5 = por %p212_p2, %p211_p0  ;;  %p1041_p6 = por %p218_p4, %p217_p3 }
   0xa   : > { %p791_p7 = scmp.ge.s32.totalorder %s942_s30, 1  ;;  %p265_p8 = scmp.lt.s32.totalorder %s942_s30, 3 }
   0xc   : > { %p266_p9 = pnand %p791_p7, %p265_p8 }
   0xd   : > { %p299_p10 = scmp.lt.s32.totalorder (!%p266_p9), %s1020_s9, 1  ;;  %s945_s26 = smov (!%p266_p9), 113  }
   0xe   : > { %269 = sbr.rel (%p266_p9) target bundleno = 835 (0x343), region = 52  ;;  %s946_s10 = smov (!%p266_p9), 111  }
   0xf   : > { %s947_s12 = smov (!%p266_p9), 112   ;;  %s948_s13 = smov (!%p266_p9), 127  }
  0x10   : > { %s949_s17 = smov (!%p266_p9), 15   ;;  %s950_s18 = smov (!%p266_p9), 1  }
  0x11   : > { %s817_s21 = sshll.u32 (!%p266_p9), %s1020_s9, 6 }
  0x13   : > { %v944_v0 = vmov 0   ;;  %v308_v1 = vld [vmem:[%s1207_s3] sm:$0xff]  ;;  %s300_s19 = scalar_select %p299_p10, %s1020_s9, 1  ;;  %vm353_vm0 = vcmask 1041408   ;;  %vm349_vm1 = vcmask 162816   ;;  %v407_v22 = vlaneseq }
  0x14   : > { %392 = vmatprep.mubr.bf16.mxu0 %v944_v0  ;;  %867 = vset.pattern.permute.xlu0 %v944_v0  ;;  %v305_v8 = vld [vmem:[%s1206_s2] sm:$0xf]  ;;  %v799_v27 = vld [vmem:[%s1205_s1 + $0x7] ss:$8 sm:$0x3]  ;;  %vm584_vm6 = vcmask 1043456  }
  0x15   : > { %331 = vperm.xlu0 %867, %v308_v1   ;;  %623 = vmatprep.mubr.bf16.mxu1 %v944_v0  ;;  %s818_s20 = smul.u32 24, %s300_s19  ;;  %s951_s19 = smov 17   ;;  %v310_v18 = vld [vmem:[%s1211_s7] sm:$0x3]  ;;  %v414_v24 = vshrl.u32 %v407_v22, 7  ;;  %v1084_v26 = vand.u32 127, %v407_v22 }
  0x16   : > { %868 = vset.pattern.permute.xlu1 %v944_v0  ;;  %v309_v19 = vld [vmem:[%s1209_s5] sm:$0xff]  ;;  %v800_v28 = vld [vmem:[%s1205_s1 + $0x10] ss:$8 sm:$0x3]  ;;  %vm580_vm11 = vcmask 588800   ;;  %vm641_vm12 = vcmask 64512  }
  0x17   : > { %s303_s23 = scalar_lea.vmem %s1204_s0, %s818_s20  ;;  %s952_s20 = smov 16   ;;  %v1092_v29 = vsub.s32 0, %v414_v24  ;;  %v1094_v30 = vsub.s32 1, %v414_v24  ;;  %vm529_vm2 = vcmp.lt.s32.totalorder %v1084_v26, 112  ;;  %vm509_vm3 = vcmp.lt.s32.totalorder %v1084_v26, 113 }
  0x18   : > { %v328_v2 = vld [vmem:[%s303_s23 + $0x10] sm:$0x33]  ;;  %v871_v5 = vld [vmem:[%s303_s23 + $0x4] ss:$8 sps:$4 sm:$0xff]   ;;  %v873_v7 = vld [vmem:[%s303_s23] ss:$8 sps:$4 sm:$0xff]  }
  0x19   : > { %v804_v3 = vcombine.high %v328_v2, %v328_v2  ;;  %v803_v4 = vcombine.low %v328_v2, %v328_v2  ;;  %v798_v33 = vld [vmem:[%s1205_s1 + $0x6] ss:$8 sm:$0x3]  ;;  %v540_v34 = vrot.slane %v799_v27, %v1094_v30  ;;  %vm549_vm4 = vcmp.lt.s32.totalorder %v1084_v26, 111 }
  0x1a   : > { %v556_v35 = vrot.slane %v800_v28, %v1092_v29  ;;  %v797_v36 = vld [vmem:[%s1205_s1 + $0x5] ss:$8 sm:$0x3]  ;;  %v560_v37 = vrot.slane %v800_v28, %v1094_v30  ;;  %v520_v39 = vrot.slane %v798_v33, %v1094_v30  ;;  %v536_v40 = vrot.slane %v799_v27, %v1092_v29  ;;  %v796_v51 = vld [vmem:[%s1205_s1 + $0x3] ss:$8 sm:$0x3] }
  0x1b   : > { %805 = vmatprep.subr.msk.bf16.mxu0 %vm353_vm0, %v804_v3  ;;  %v355_v6 = vsel %vm353_vm0, %v803_v4, 0  ;;  %vm489_vm5 = vcmp.lt.s32.totalorder %v1084_v26, 127  ;;  %v500_v46 = vrot.slane %v797_v36, %v1094_v30  ;;  %v516_v52 = vrot.slane %v798_v33, %v1092_v29  ;;  %v795_v62 = vld [vmem:[%s1205_s1 + $0x2] ss:$8 sm:$0x3] }
  0x1c   : > { %373 = vmatpush1.bf16.msra.mxu0 %v355_v6  ;;  %v496_v53 = vrot.slane %v797_v36, %v1092_v29  ;;  %vm449_vm7 = vcmp.lt.s32.totalorder %v1084_v26, 15  ;;  %vm469_vm8 = vcmp.lt.s32.totalorder %v1084_v26, 1  ;;  %v480_v63 = vrot.slane %v796_v51, %v1094_v30 }
  0x1d   : > { %374 = vmatprep.subr.bf16.mxu0 %v871_v5  ;;  %v460_v5 = vrot.slane %v795_v62, %v1094_v30  ;;  %vm409_vm9 = vcmp.lt.s32.totalorder %v1084_v26, 17  ;;  %vm429_vm10 = vcmp.lt.s32.totalorder %v1084_v26, 16 }
  0x20   : > { %375 = vmatpush1.bf16.msra.mxu0 %v873_v7  ;;  %v476_v7 = vrot.slane %v796_v51, %v1092_v29 }
  0x23   : > { %806 = vmatmul.mubr.msk.bf16.vlgmr.msra.gmra.mxu0 %vm349_vm1, %v305_v8 }
  0x24   : > { %683 = vmatprep.mubr.bf16.mxu0 %v944_v0 }
  0x90   : > { %v332_v9 = vpop.permute.xlu0 %331 }
  0xe3   : > { %v394_v10 = vpop.f32.mrf.mxu0 }
  0xe4   : > { %v395_v11 = vadd.f32 %v394_v10, %v332_v9 }
  0xe5   : > { %v396_v12 = vpop.f32.mrf.mxu0 }
  0xe6   : > { %v1058_v13 = vmax.f32 %v395_v11, 0.0  ;;  %v397_v14 = vadd.f32 %v396_v12, %v332_v9 }
  0xe7   : > { %v398_v15 = vpop.f32.mrf.mxu0 }
  0xe8   : > { %505 = vrot.lane.b32.xlu1 %v1058_v13, %s945_s26  ;;  %545 = vrot.lane.b32.xlu0 %v1058_v13, %s946_s10  ;;  %v1062_v17 = vmax.f32 %v397_v14, 0.0 }
  0xe9   : > { %v399_v16 = vpop.f32.mrf.mxu0 }
  0xec   : > { %525 = vrot.lane.b32.xlu1 %v1058_v13, %s947_s12  ;;  %507 = vrot.lane.b32.xlu0 %v1062_v17, %s945_s26  ;;  %s727_s26 = scalar_lea.hbm %s1212_s8, %s817_s21 }
  0xf0   : > { %485 = vrot.lane.b32.xlu1 %v1058_v13, %s948_s13  ;;  %527 = vrot.lane.b32.xlu0 %v1062_v17, %s947_s12 }
  0xf4   : > { %547 = vrot.lane.b32.xlu1 %v1062_v17, %s946_s10  ;;  %487 = vrot.lane.b32.xlu0 %v1062_v17, %s948_s13  ;;  %s953_s13 = smov [#allocation2]  }
  0xf8   : > { %445 = vrot.lane.b32.xlu1 %v1058_v13, %s949_s17  ;;  %447 = vrot.lane.b32.xlu0 %v1062_v17, %s949_s17  ;;  %s886_s17 = sshll.u32 %s953_s13, 4  ;;  %s887_s17 = int_to_ptr.vmem [resolvable:$false] %s886_s17 }
  0xf9   : > { %s888_s9 = scalar_lea.vmem %s887_s17, 128 }
  0xfc   : > { %465 = vrot.lane.b32.xlu1 %v1058_v13, %s950_s18  ;;  %467 = vrot.lane.b32.xlu0 %v1062_v17, %s950_s18 }
 0x100   : > { %403 = vrot.lane.b32.xlu1 %v1058_v13, %s951_s19  ;;  %405 = vrot.lane.b32.xlu0 %v1062_v17, %s951_s19  ;;  %s296_s19 = sand.u32 1, %s934_s28  }
 0x101   : > { %s715_s10 = scalar_lea.sflag [#allocation3], %s296_s19 }
 0x104   : > { %425 = vrot.lane.b32.xlu1 %v1058_v13, %s952_s20  ;;  %427 = vrot.lane.b32.xlu0 %v1062_v17, %s952_s20  ;;  %s792_s20 = sshll.u32 %s296_s19, 2 }
 0x105   : > { %s298_s22 = scalar_lea.vmem [#allocation2], %s792_s20 }
 0x106   : > { %s729_s23 = sshll.u32 %s298_s22, 4  ;;  %s730_s23 = int_to_ptr.vmem [resolvable:$true] %s729_s23 }
 0x107   : > { %s882_s12 = scalar_lea.vmem %s730_s23, 64  ;;  %p889_p0 = scmp.lt.s32.totalorder %s730_s23, %s887_s17 }
 0x108   : > { %638 = vperm.xlu0 %867, %v310_v18   ;;  %577 = vperm.xlu1 %868, %v309_v19   ;;  %v311_v18 = vld [vmem:[%s1205_s1] ss:$8 sm:$0x3]  ;;  %v456_v19 = vrot.slane %v795_v62, %v1092_v29  ;;  %p883_p11 = scmp.ne.s32.totalorder %s730_s23, %s882_s12  ;;  %p890_p1 = scmp.lt.s32.totalorder %s888_s9, %s882_s12 }
 0x109   : > { %v420_v27 = vrot.slane %v311_v18, %v1094_v30 }
 0x10a   : > { %p884_p12 = pnand %p883_p11, %p1037_p5  ;;  %p891_p2 = por %p890_p1, %p889_p0 }
 0x10c   : > { %p885_p13 = pneg %p884_p12 }
 0x10e   : > { %p892_p3 = pnand %p891_p2, %p885_p13 }
 0x15a   : > { %v506_v20 = vpop.permute.xlu1 %505  ;;  %v546_v21 = vpop.permute.xlu0 %545 }
 0x15e   : > { %v526_v23 = vpop.permute.xlu1 %525  ;;  %v508_v25 = vpop.permute.xlu0 %507 }
 0x15f   : > { %v511_v43 = vsel %vm509_vm3, %v508_v25, %v506_v20  ;;  %v510_v55 = vsel %vm509_vm3, %v506_v20, %v508_v25  ;;  %v794_v20 = vld [vmem:[%s1205_s1 + $0x1] ss:$8 sm:$0x3]  ;;  %v416_v25 = vrot.slane %v311_v18, %v1092_v29 }
 0x160   : > { %v524_v56 = vmul.f32 %v520_v39, %v511_v43  ;;  %v523_v4 = vmul.f32 %v516_v52, %v510_v55  ;;  %v440_v33 = vrot.slane %v794_v20, %v1094_v30 }
 0x162   : > { %v486_v31 = vpop.permute.xlu1 %485  ;;  %v528_v32 = vpop.permute.xlu0 %527 }
 0x163   : > { %v531_v38 = vsel %vm529_vm2, %v528_v32, %v526_v23  ;;  %v530_v47 = vsel %vm529_vm2, %v526_v23, %v528_v32  ;;  %v436_v32 = vrot.slane %v794_v20, %v1092_v29  ;;  %v306_v29 = vld [vmem:[%s1208_s4] sm:$0xf] }
 0x164   : > { %v544_v48 = vmul.f32 %v540_v34, %v531_v38  ;;  %v543_v61 = vmul.f32 %v536_v40, %v530_v47 }
 0x166   : > { %v548_v41 = vpop.permute.xlu1 %547  ;;  %v488_v42 = vpop.permute.xlu0 %487  ;;  %v572_v3 = vpack.c.bf16 %v544_v48, %v524_v56  ;;  %v571_v12 = vpack.c.bf16 %v543_v61, %v523_v4 }
 0x167   : > { %v550_v44 = vsel %vm549_vm4, %v546_v21, %v548_v41  ;;  %v551_v45 = vsel %vm549_vm4, %v548_v41, %v546_v21  ;;  %v491_v54 = vsel %vm489_vm5, %v488_v42, %v486_v31  ;;  %v490_v0 = vsel %vm489_vm5, %v486_v31, %v488_v42 }
 0x168   : > { %v563_v49 = vmul.f32 %v556_v35, %v550_v44  ;;  %v564_v50 = vmul.f32 %v560_v37, %v551_v45  ;;  %v504_v1 = vmul.f32 %v500_v46, %v491_v54  ;;  %v503_v9 = vmul.f32 %v496_v53, %v490_v0 }
 0x16a   : > { %v446_v57 = vpop.permute.xlu1 %445  ;;  %v448_v58 = vpop.permute.xlu0 %447  ;;  %v574_v59 = vpack.c.bf16 %v564_v50, %v564_v50  ;;  %v573_v60 = vpack.c.bf16 %v563_v49, %v563_v49  ;;  %v570_v16 = vpack.c.bf16 %v504_v1, %v1062_v17  ;;  %v569_v28 = vpack.c.bf16 %v503_v9, %v1058_v13 }
 0x16b   : > { %v450_v10 = vsel %vm449_vm7, %v446_v57, %v448_v58  ;;  %v451_v21 = vsel %vm449_vm7, %v448_v58, %v446_v57  ;;  %v307_v57 = vld [vmem:[%s1210_s6] sm:$0x1] }
 0x16c   : > { %807 = vmatprep.subr.msk.bf16.mxu1 %vm584_vm6, %v574_v59  ;;  %v586_v2 = vsel %vm584_vm6, %v573_v60, 0  ;;  %v464_v22 = vmul.f32 %v460_v5, %v450_v10  ;;  %v463_v34 = vmul.f32 %v456_v19, %v451_v21 }
 0x16d   : > { %598 = vmatpush1.bf16.msra.mxu1 %v586_v2 }
 0x16e   : > { %v466_v6 = vpop.permute.xlu1 %465  ;;  %599 = vmatprep.subr.bf16.mxu1 %v572_v3  ;;  %v468_v8 = vpop.permute.xlu0 %467 }
 0x16f   : > { %v470_v11 = vsel %vm469_vm8, %v466_v6, %v468_v8  ;;  %v471_v14 = vsel %vm469_vm8, %v468_v8, %v466_v6 }
 0x170   : > { %v484_v15 = vmul.f32 %v480_v63, %v470_v11  ;;  %v483_v24 = vmul.f32 %v476_v7, %v471_v14 }
 0x171   : > { %600 = vmatpush1.bf16.msra.mxu1 %v571_v12 }
 0x172   : > { %v404_v23 = vpop.permute.xlu1 %403  ;;  %601 = vmatprep.subr.bf16.mxu1 %v570_v16  ;;  %v406_v17 = vpop.permute.xlu0 %405  ;;  %v568_v31 = vpack.c.bf16 %v484_v15, %v464_v22  ;;  %v567_v41 = vpack.c.bf16 %v483_v24, %v463_v34 }
 0x173   : > { %v410_v35 = vsel %vm409_vm9, %v404_v23, %v406_v17  ;;  %v411_v36 = vsel %vm409_vm9, %v406_v17, %v404_v23 }
 0x174   : > { %v423_v42 = vmul.f32 %v416_v25, %v411_v36  ;;  %v424_v43 = vmul.f32 %v420_v27, %v410_v35 }
 0x175   : > { %602 = vmatpush1.bf16.msra.mxu1 %v569_v28 }
 0x176   : > { %v426_v37 = vpop.permute.xlu1 %425  ;;  %603 = vmatprep.subr.bf16.mxu1 %v568_v31  ;;  %v428_v38 = vpop.permute.xlu0 %427 }
 0x177   : > { %v430_v39 = vsel %vm429_vm10, %v426_v37, %v428_v38  ;;  %v431_v40 = vsel %vm429_vm10, %v428_v38, %v426_v37 }
 0x178   : > { %v443_v13 = vmul.f32 %v436_v32, %v431_v40  ;;  %v444_v44 = vmul.f32 %v440_v33, %v430_v39 }
 0x179   : > { %604 = vmatpush1.bf16.msra.mxu1 %v567_v41 }
 0x17a   : > { %v566_v26 = vpack.c.bf16 %v444_v44, %v424_v43  ;;  %v565_v45 = vpack.c.bf16 %v443_v13, %v423_v42 }
 0x17c   : > { %605 = vmatprep.subr.bf16.mxu1 %v566_v26 }
 0x17d   : > { %606 = vmatpush1.bf16.msra.mxu1 %v565_v45 }
 0x180   : > { %808 = vmatmul.mubr.msk.bf16.vlgmr.msra.gmra.mxu1 %vm580_vm11, %v306_v29 }
 0x183   : > { %v578_v30 = vpop.permute.xlu1 %577  ;;  %v639_v58 = vpop.permute.xlu0 %638 }
 0x240   : > { %v625_v46 = vpop.f32.mrf.mxu1 }
 0x241   : > { %v626_v47 = vadd.f32 %v625_v46, %v578_v30 }
 0x242   : > { %v627_v48 = vpop.f32.mrf.mxu1 }
 0x243   : > { %v632_v49 = vmax.f32 %v626_v47, 0.0  ;;  %v628_v50 = vadd.f32 %v627_v48, %v578_v30 }
 0x244   : > { %v629_v51 = vpop.f32.mrf.mxu1 }
 0x245   : > { %v634_v52 = vpack.c.bf16 %v632_v49, %v632_v49  ;;  %v633_v53 = vmax.f32 %v628_v50, 0.0 }
 0x246   : > { %v630_v54 = vpop.f32.mrf.mxu1 }
 0x247   : > { %v635_v55 = vpack.c.bf16 %v633_v53, %v633_v53  ;;  %v646_v56 = vsel %vm584_vm6, %v634_v52, 0 }
 0x249   : > { %809 = vmatprep.subr.msk.bf16.mxu0 %vm584_vm6, %v635_v55 }
 0x24a   : > { %666 = vmatpush1.bf16.msra.mxu0 %v646_v56 }
 0x24d   : > { %810 = vmatmul.mubr.msk.bf16.vlgmr.msra.gmra.mxu0 %vm641_vm12, %v307_v57 }
 0x30d   : > { %v685_v59 = vpop.f32.mrf.mxu0 }
 0x30e   : > { %v686_v60 = vadd.f32 %v685_v59, %v639_v58 }
 0x30f   : > { %v687_v61 = vpop.f32.mrf.mxu0 }
 0x310   : > { %v692_v62 = vsub.f32 0.0, %v686_v60  ;;  %v688_v63 = vadd.f32 %v687_v61, %v639_v58 }
 0x311   : > { %v689_v0 = vpop.f32.mrf.mxu0 }
 0x312   : > { %v694_v1 = vmul.f32 1.442695, %v692_v62  ;;  %v693_v2 = vsub.f32 0.0, %v688_v63 }
 0x313   : > { %v690_v3 = vpop.f32.mrf.mxu0 }
 0x314   : > { %874 = vpow2.f32 %v694_v1  ;;  %v696_v4 = vmul.f32 1.442695, %v693_v2 }
 0x316   : > { %876 = vpow2.f32 %v696_v4 }
 0x321   : > { %v875_v5 = vpop.eup %874 }
 0x322   : > { %v698_v6 = vadd.f32 1.0, %v875_v5 }
 0x323   : > { %v877_v7 = vpop.eup %876 }
 0x324   : > { %v699_v8 = vadd.f32 1.0, %v877_v7  ;;  %878 = vrcp.f32 %v698_v6 }
 0x326   : > { %880 = vrcp.f32 %v699_v8 }
 0x331   : > { %v879_v9 = vpop.eup %878 }
 0x333   : > { %v881_v10 = vpop.eup %880 }
 0x334   : > { %v704_v11 = vcombine.low %v879_v9, %v881_v10 }
 0x336   : > { %811 = vst.sshfl [vmem:[%s298_s22] sm:$0x33 pattern:$0x76325410] %v704_v11 }
 0x337   : > { %895 = shalt.err (!%p892_p3)
}
 0x338   : > { %s896_s18 = scalar_lea.hbm %s727_s26, 64  ;;  %s900_s21 = scalar_lea.hbm %s1212_s8, 128 }
 0x339   : > { %p897_p4 = scmp.ne.s32.totalorder %s727_s26, %s896_s18  ;;  %p901_p9 = scmp.lt.s32.totalorder %s727_s26, %s1212_s8 }
 0x33a   : > { %p902_p10 = scmp.lt.s32.totalorder %s900_s21, %s896_s18 }
 0x33b   : > { %p898_p7 = pnand %p897_p4, %p1037_p5 }
 0x33c   : > { %p903_p11 = por %p902_p10, %p901_p9 }
 0x33d   : > { %p899_p8 = pneg %p898_p7 }
 0x33f   : > { %p904_p12 = pnand %p903_p11, %p899_p8 }
 0x341   : > { %907 = shalt.err (!%p904_p12)
}
 0x342   : > { %819 = dma.vmem_to_hbm [thread:$0]  (%p1037_p5), %s730_s23, 64, %s727_s26, %s715_s10  }
 0x343 PF: > { %p825_p13 = scmp.ge.s32.totalorder %s942_s30, 2  ;;  %s741_s25 = sand.u32 1, %s930_s27  }
 0x344   : > { %s742_s12 = scalar_lea.sflag [#allocation3], %s741_s25 }
 0x345   : > { %p822_p0 = pnand %p825_p13, %p1041_p6 }
 0x347   : > { %p823_p1 = pneg %p822_p0 }
 0x349   : > { %925 = dma.done.wait (%p823_p1), %s742_s12, 64  }
 0x34a   : > { %927 = vsyncadd (%p823_p1), %s742_s12, 4294967232  ;;  %p18_p2 = scmp.ge.s32.totalorder %s1024_s11, 4   ;;  %s1215_s27 = smov %s934_s28 }
 0x34b   : > { %s1216_s28 = smov %s938_s29  ;;  %s1217_s29 = smov %s1035_s14 }
 0x34c   : > { %s1218_s30 = smov %s1024_s11  ;;  %20 = sbr.rel (!%p18_p2) target bundleno = 3 (0x3), region = 94 }
 0x351   :  { %747 = vsyncpa [#allocation3], 1 }
 0x352   :  { %749 = vsyncpa [#allocation3 + $0x1], 1 }

</bundles_post_ra>
